<compile_context>
chip_gen: v5e
topology: v5e:2x2
jax: 0.10.0
libtpu: 0.0.40
codegen_flags: <defaults>
</compile_context>

<pallas_src>
import functools

import jax
import jax.numpy as jnp
import numpy as np
from jax.experimental import pallas as pl
from jax.experimental.pallas import tpu as pltpu


def _round_up(x, m):
    return (x + m - 1) // m * m


# Conservative resident-Y budget (bytes).  Double-buffered worst case is 2x this,
# which still leaves headroom next to the A tiles inside v7x's 64 MiB VMEM/TC.
_Y_RESIDENT_BUDGET = 12 * 1024 * 1024
_VMEM_LIMIT = 48 * 1024 * 1024


# ---------------------------------------------------------------------------
# Kernel 1: per-edge attention, lane-dense [E_rows, 128] with large row blocks
#   attn = sigmoid(s[row] + t[col] (+ bias folded into s)) * edge_weight
# ---------------------------------------------------------------------------
def _edge_attn_kernel(s_ref, t_ref, ew_ref, o_ref):
    o_ref[...] = jax.nn.sigmoid(s_ref[...] + t_ref[...]) * ew_ref[...]


def _edge_attention(s_lanes, t_lanes, ew_lanes, row_blk):
    E_rows = s_lanes.shape[0]                  # multiple of row_blk
    blk = pl.BlockSpec((row_blk, 128), lambda i: (i, 0))
    return pl.pallas_call(
        _edge_attn_kernel,
        out_shape=jax.ShapeDtypeStruct((E_rows, 128), jnp.float32),
        grid=(E_rows // row_blk,),
        in_specs=[blk, blk, blk],
        out_specs=blk,
        compiler_params=pltpu.CompilerParams(
            dimension_semantics=("parallel",)),
    )(s_lanes, t_lanes, ew_lanes)


# ---------------------------------------------------------------------------
# Kernel 2: pre-scaled feature projection  y = dinv ⊙ (x @ W^T)   (bf16 out)
#   F_in is zero-padded to 128 so loads are lane-dense.
# ---------------------------------------------------------------------------
def _proj_scale_kernel(x_ref, w_ref, dinv_ref, y_ref):
    xw = jnp.dot(x_ref[...], w_ref[...], preferred_element_type=jnp.float32)
    y_ref[...] = (dinv_ref[...] * xw).astype(y_ref.dtype)


def _project_scale(x_pad, w_t_pad, dinv, tm):
    N_pad, F_in_pad = x_pad.shape
    F_out_pad = w_t_pad.shape[1]
    return pl.pallas_call(
        _proj_scale_kernel,
        out_shape=jax.ShapeDtypeStruct((N_pad, F_out_pad), jnp.bfloat16),
        grid=(N_pad // tm,),
        in_specs=[pl.BlockSpec((tm, F_in_pad), lambda i: (i, 0)),
                  pl.BlockSpec((F_in_pad, F_out_pad), lambda i: (0, 0)),
                  pl.BlockSpec((tm, 1), lambda i: (i, 0))],
        out_specs=pl.BlockSpec((tm, F_out_pad), lambda i: (i, 0)),
        compiler_params=pltpu.CompilerParams(
            dimension_semantics=("parallel",),
            vmem_limit_bytes=_VMEM_LIMIT),
    )(x_pad, w_t_pad, dinv)


# ---------------------------------------------------------------------------
# Kernel 3: tiled aggregation  out = dinv ⊙ (A @ y) + bias
#   A : [N_pad, N_pad] bf16 (A[target, source] = attn, self-loops on diag)
#   y : [N_pad, F_out_pad] bf16 (already scaled by dinv on the source side)
#   Accumulate directly into the f32 output block (no scratch); y is either
#   fully VMEM-resident (sliced with pl.ds) or streamed per contraction block.
# ---------------------------------------------------------------------------
def _aggregate_kernel(a_ref, y_ref, dinv_ref, b_ref, o_ref, *, y_resident, tk):
    k = pl.program_id(1)

    @pl.when(k == 0)
    def _():
        o_ref[...] = jnp.zeros_like(o_ref)

    if y_resident:
        off = pl.multiple_of(k * tk, tk)
        y_blk = y_ref[pl.ds(off, tk), :]
    else:
        y_blk = y_ref[...]

    o_ref[...] += jnp.dot(a_ref[...], y_blk, preferred_element_type=jnp.float32)

    @pl.when(k == pl.num_programs(1) - 1)
    def _():
        o_ref[...] = dinv_ref[...] * o_ref[...] + b_ref[...]


def _aggregate(a_bf16, y_bf16, dinv, bias, tm, tk, y_resident):
    N_pad = a_bf16.shape[0]
    F_out_pad = y_bf16.shape[1]

    if y_resident:
        y_spec = pl.BlockSpec((N_pad, F_out_pad), lambda i, k: (0, 0))
        y_bytes = N_pad * F_out_pad * 2
    else:
        y_spec = pl.BlockSpec((tk, F_out_pad), lambda i, k: (k, 0))
        y_bytes = (N_pad // tm) * N_pad * F_out_pad * 2

    cost = pl.CostEstimate(
        flops=2 * N_pad * N_pad * F_out_pad,
        transcendentals=0,
        bytes_accessed=N_pad * N_pad * 2 + y_bytes + N_pad * F_out_pad * 4)

    kernel = functools.partial(_aggregate_kernel, y_resident=y_resident, tk=tk)
    return pl.pallas_call(
        kernel,
        out_shape=jax.ShapeDtypeStruct((N_pad, F_out_pad), jnp.float32),
        grid_spec=pltpu.PrefetchScalarGridSpec(
            num_scalar_prefetch=0,
            grid=(N_pad // tm, N_pad // tk),
            in_specs=[pl.BlockSpec((tm, tk), lambda i, k: (i, k)),
                      y_spec,
                      pl.BlockSpec((tm, 1), lambda i, k: (i, 0)),
                      pl.BlockSpec((1, F_out_pad), lambda i, k: (0, 0))],
            out_specs=pl.BlockSpec((tm, F_out_pad), lambda i, k: (i, 0))),
        compiler_params=pltpu.CompilerParams(
            dimension_semantics=("parallel", "arbitrary"),
            vmem_limit_bytes=_VMEM_LIMIT),
        cost_estimate=cost,
    )(a_bf16, y_bf16, dinv, bias)


def _pick_tiles(N):
    # 256-aligned tiles (v6e/v7x MXU); large graphs get big A tiles.
    if N <= 512:
        tm = tk = _round_up(max(N, 1), 256)
    else:
        tm = 512
        tk = 2048 if N >= 2048 else (1024 if N >= 1024 else 512)
    return tm, tk


# ---------------------------------------------------------------------------
# AttentionGCN forward (Pallas)
# ---------------------------------------------------------------------------
def attention_gcn_forward(params, x, edge_index, edge_weight=None):
    x = x.astype(jnp.float32)
    N, F_in = x.shape
    E = edge_index.shape[1]
    row, col = edge_index[0], edge_index[1]

    lin_w = params["lin_w"].astype(jnp.float32)        # [1, 2F]
    lin_b = params["lin_b"].astype(jnp.float32)        # [1]
    gcn_w = params["gcn_w"].astype(jnp.float32)        # [F_out, F_in]
    gcn_b = params["gcn_b"].astype(jnp.float32)        # [F_out]
    F_out = gcn_w.shape[0]

    # --- per-node attention projections (tiny [N,F]@[F,1] dots, glue) ------
    w_src = lin_w[:, :F_in].T                          # [F_in, 1]
    w_dst = lin_w[:, F_in:].T                          # [F_in, 1]
    s = (x @ w_src + lin_b)[:, 0]                      # bias folded into src half
    t = (x @ w_dst)[:, 0]

    # --- per-edge attention (Pallas, lane-dense, big blocks) -----------------
    if edge_weight is None:
        ew = jnp.ones((E,), jnp.float32)
    else:
        ew = edge_weight.astype(jnp.float32).reshape(-1)

    rows_min = _round_up(E, 8 * 128) // 128            # multiple of 8
    row_blk = min(512, rows_min)
    E_rows = _round_up(rows_min, row_blk)
    E_pad = E_rows * 128

    def _lanes(v):
        return jnp.pad(v, (0, E_pad - E)).reshape(E_rows, 128)

    attn_lanes = _edge_attention(_lanes(s[row]), _lanes(t[col]), _lanes(ew),
                                 row_blk)
    attn = attn_lanes.reshape(-1)[:E]                  # [E]
    # Round once to bf16 so deg/dinv match the bf16 adjacency used in the matmul.
    attn_q = attn.astype(jnp.bfloat16).astype(jnp.float32)

    # --- tile sizes / padding ------------------------------------------------
    tm, tk = _pick_tiles(N)
    N_pad = _round_up(N, max(tm, tk))
    F_in_pad = _round_up(F_in, 128)
    F_out_pad = _round_up(F_out, 128)

    y_resident = N_pad * F_out_pad * 2 <= _Y_RESIDENT_BUDGET
    if (not y_resident) and (N_pad % (2 * tm) == 0):
        tm *= 2                                        # halve y re-streaming factor

    # --- degree / normalization vectors (O(E) segment sum, glue) -------------
    diag = jnp.arange(N)
    deg = (jnp.zeros((N_pad,), jnp.float32)
           .at[col].add(attn_q)                        # weighted in-degree
           .at[diag].add(1.0))                         # self-loop weight 1
    dinv = jnp.where(deg > 0.0, jax.lax.rsqrt(deg), 0.0).reshape(N_pad, 1)

    # --- dense weighted adjacency, self-loops on diagonal (scatter, glue) ----
    # TODO(synk): CSR gather/segment-sum Pallas kernel for E << N^2 graphs.
    a = (jnp.zeros((N_pad, N_pad), jnp.float32)
         .at[col, row].add(attn_q)
         .at[diag, diag].add(1.0)).astype(jnp.bfloat16)

    # --- y = dinv ⊙ (x @ W^T)  (Pallas, lane-dense) ---------------------------
    x_pad = jnp.pad(x, ((0, N_pad - N), (0, F_in_pad - F_in)))
    w_t_pad = jnp.pad(gcn_w.T, ((0, F_in_pad - F_in), (0, F_out_pad - F_out)))
    y = _project_scale(x_pad, w_t_pad, dinv, tm)       # bf16 [N_pad, F_out_pad]

    # --- out = dinv ⊙ (A @ y) + b  (Pallas, tiled, y resident when possible) --
    bias = jnp.pad(gcn_b, (0, F_out_pad - F_out)).reshape(1, F_out_pad)
    out = _aggregate(a, y, dinv, bias, tm, tk, y_resident)
    return out[:N, :F_out]


# ---------------------------------------------------------------------------
# Pure-JAX f32 reference for validation
# ---------------------------------------------------------------------------
def attention_gcn_reference(params, x, edge_index, edge_weight=None):
    N = x.shape[0]
    row, col = edge_index[0], edge_index[1]
    feat = jnp.concatenate([x[row], x[col]], axis=1)
    attn = jax.nn.sigmoid(feat @ params["lin_w"].T + params["lin_b"]).squeeze()
    if edge_weight is not None:
        attn = attn * edge_weight
    a = jnp.zeros((N, N), jnp.float32).at[col, row].add(attn)
    a = a + jnp.eye(N, dtype=jnp.float32)
    deg = a.sum(axis=1)
    dinv = jnp.where(deg > 0.0, 1.0 / jnp.sqrt(deg), 0.0)
    a_norm = dinv[:, None] * a * dinv[None, :]
    return a_norm @ (x @ params["gcn_w"].T) + params["gcn_b"]


def _make_case(key, N, E, in_dim, out_dim):
    k_x, k_r, k_o, k_ew, k_lw, k_lb, k_gw, k_gb = jax.random.split(key, 8)
    x = jax.random.normal(k_x, (N, in_dim), jnp.float32)
    row = jax.random.randint(k_r, (E,), 0, N)
    off = jax.random.randint(k_o, (E,), 1, N)
    col = (row + off) % N                              # self-loop free
    edge_index = jnp.stack([row, col], axis=0)         # [2, E]
    edge_weight = jax.random.uniform(k_ew, (E,), jnp.float32, 0.5, 1.5)
    params = {
        "lin_w": jax.random.normal(k_lw, (1, 2 * in_dim), jnp.float32) * 0.1,
        "lin_b": jax.random.normal(k_lb, (1,), jnp.float32) * 0.1,
        "gcn_w": jax.random.normal(k_gw, (out_dim, in_dim), jnp.float32) * 0.1,
        "gcn_b": jax.random.normal(k_gb, (out_dim,), jnp.float32) * 0.1,
    }
    return params, x, edge_index, edge_weight


if __name__ == "__main__":
    key = jax.random.PRNGKey(0)
    k1, k2 = jax.random.split(key)

    # Case 1: small graph (single-block path), shapes match the module spec.
    params, x, ei, ew = _make_case(k1, N=16, E=40, in_dim=8, out_dim=4)
    out = jax.block_until_ready(attention_gcn_forward(params, x, ei, ew))
    ref = attention_gcn_reference(params, x, ei, ew)
    np.testing.assert_allclose(np.asarray(out), np.asarray(ref),
                               rtol=2e-2, atol=1e-2)

    # Case 2: larger graph exercising the multi-block (2x2 grid) resident-y path.
    params2, x2, ei2, ew2 = _make_case(k2, N=600, E=2000, in_dim=8, out_dim=4)
    out2 = jax.block_until_ready(attention_gcn_forward(params2, x2, ei2, ew2))
    ref2 = attention_gcn_reference(params2, x2, ei2, ew2)
    np.testing.assert_allclose(np.asarray(out2), np.asarray(ref2),
                               rtol=2e-2, atol=1e-2)

    print("KERNEL_OK")
</pallas_src>

<mosaic_0001>
module attributes {stable_mosaic.version = 11 : i64} {
  func.func @_edge_attn_kernel(%arg0: i32, %arg1: memref<8x128xf32, #tpu.memory_space<vmem>>, %arg2: memref<8x128xf32, #tpu.memory_space<vmem>>, %arg3: memref<8x128xf32, #tpu.memory_space<vmem>>, %arg4: memref<8x128xf32, #tpu.memory_space<vmem>>) attributes {dimension_semantics = [#tpu.dimension_semantics<parallel>], iteration_bounds = array<i64: 1>, scalar_prefetch = 0 : i64, scratch_operands = 0 : i64, tpu.core_type = #tpu.core_type<tc>, window_params = [{transform_indices = @transform_0, window_bounds = array<i64: 8, 128>}, {transform_indices = @transform_1, window_bounds = array<i64: 8, 128>}, {transform_indices = @transform_2, window_bounds = array<i64: 8, 128>}, {transform_indices = @transform_3, window_bounds = array<i64: 8, 128>}]} {
    %c0 = arith.constant 0 : index
    %c0_0 = arith.constant 0 : index
    %0 = vector.load %arg1[%c0, %c0_0] : memref<8x128xf32, #tpu.memory_space<vmem>>, vector<8x128xf32>
    %c0_1 = arith.constant 0 : index
    %c0_2 = arith.constant 0 : index
    %1 = vector.load %arg2[%c0_1, %c0_2] : memref<8x128xf32, #tpu.memory_space<vmem>>, vector<8x128xf32>
    %2 = arith.addf %0, %1 : vector<8x128xf32>
    %3 = arith.negf %2 : vector<8x128xf32>
    %4 = math.exp %3 : vector<8x128xf32>
    %cst = arith.constant 1.000000e+00 : f32
    %5 = vector.broadcast %cst : f32 to vector<8x128xf32>
    %6 = arith.addf %5, %4 : vector<8x128xf32>
    %7 = arith.divf %5, %6 : vector<8x128xf32>
    %c0_3 = arith.constant 0 : index
    %c0_4 = arith.constant 0 : index
    %8 = vector.load %arg3[%c0_3, %c0_4] : memref<8x128xf32, #tpu.memory_space<vmem>>, vector<8x128xf32>
    %9 = arith.mulf %7, %8 : vector<8x128xf32>
    %c0_5 = arith.constant 0 : index
    %c0_6 = arith.constant 0 : index
    %10 = vector.load %arg4[%c0_5, %c0_6] : memref<8x128xf32, #tpu.memory_space<vmem>>, vector<8x128xf32>
    tpu.vector_store %arg4[%c0_5, %c0_6], %9 {strides = array<i32>} : memref<8x128xf32, #tpu.memory_space<vmem>>, vector<8x128xf32>,
    return
  }
  func.func @transform_0(%arg0: i32) -> (i32, i32) {
    %c0_i32 = arith.constant 0 : i32
    %c0_i32_0 = arith.constant 0 : i32
    return %arg0, %c0_i32 : i32, i32
  }
  func.func @transform_1(%arg0: i32) -> (i32, i32) {
    %c0_i32 = arith.constant 0 : i32
    %c0_i32_0 = arith.constant 0 : i32
    return %arg0, %c0_i32 : i32, i32
  }
  func.func @transform_2(%arg0: i32) -> (i32, i32) {
    %c0_i32 = arith.constant 0 : i32
    %c0_i32_0 = arith.constant 0 : i32
    return %arg0, %c0_i32 : i32, i32
  }
  func.func @transform_3(%arg0: i32) -> (i32, i32) {
    %c0_i32 = arith.constant 0 : i32
    %c0_i32_0 = arith.constant 0 : i32
    return %arg0, %c0_i32 : i32, i32
  }
}

</mosaic_0001>

<bundles_post_ra>
// kernel: tpu_custom_call.1
= control target key start
LH: loop header
LB: loop body
LE: loop exit
PB: predicated region body
PF: predicated region fallthrough
CT: control target
= control target key end

     0   :  { %8 = vsyncpa [#allocation3], 0  ;;  %s246_s0 = inlined_call_operand.hbm [shape: f32[8,128], index: 0, kind: input, shape index: {}]   ;;  %s247_s1 = inlined_call_operand.hbm [shape: f32[8,128], index: 1, kind: input, shape index: {}]   ;;  %s248_s2 = inlined_call_operand.hbm [shape: f32[8,128], index: 2, kind: input, shape index: {}]   ;;  %s249_s3 = inlined_call_operand.hbm [shape: f32[8,128], index: 3, kind: output, shape index: {}]  }
   0x1   :  { %9 = vsyncpa [#allocation6], 0  ;;  %s27_s14 = sshll.u32 %s247_s1, 4  ;;  %s28_s14 = int_to_ptr.hbm [resolvable:$true] %s27_s14 }
   0x2   :  { %10 = vsyncpa [#allocation4], 0  ;;  %s210_s15 = smov [#allocation5]   ;;  %s16_s19 = sshll.u32 %s246_s0, 4  ;;  %s17_s19 = int_to_ptr.hbm [resolvable:$true] %s16_s19 }
   0x3   :  { %s29_s16 = sshll.u32 %s210_s15, 4  ;;  %s211_s20 = smov [#allocation2]   ;;  %s30_s16 = int_to_ptr.vmem [resolvable:$true] %s29_s16 }
   0x4   :  { %32 = dma.hbm_to_vmem [thread:$0]  %s28_s14, 128, %s30_s16, [#allocation6]  }
   0x5   :  { %s18_s21 = sshll.u32 %s211_s20, 4  ;;  %s38_s24 = sshll.u32 %s248_s2, 4  ;;  %s19_s21 = int_to_ptr.vmem [resolvable:$true] %s18_s21  ;;  %s39_s24 = int_to_ptr.hbm [resolvable:$true] %s38_s24 }
   0x6   :  { %21 = dma.hbm_to_vmem [thread:$0]  %s17_s19, 128, %s19_s21, [#allocation3]  }
   0x7   :  { %s212_s1 = smov [#allocation7]  }
   0x8   :  { %s40_s25 = sshll.u32 %s212_s1, 4  ;;  %s41_s25 = int_to_ptr.vmem [resolvable:$true] %s40_s25 }
   0x9   :  { %43 = dma.hbm_to_vmem [thread:$0]  %s39_s24, 128, %s41_s25, [#allocation6]  }
   0xa   :  { %204 = dma.done.wait [#allocation3], 128  }
   0xb   :  { %205 = vsyncadd [#allocation3], 4294967168 }
   0xc   :  { %206 = dma.done.wait [#allocation6], 256  }
   0xd   :  { %207 = vsyncadd [#allocation6], 4294967040  ;;  %v56_v0 = vld [vmem:[#allocation2] sm:$0xff]  ;;  %v57_v1 = vld [vmem:[#allocation5] sm:$0xff]  ;;  %s213_s0 = smov [#allocation8]   ;;  %s88_s28 = sshll.u32 %s249_s3, 4  ;;  %s89_s28 = int_to_ptr.hbm [resolvable:$true] %s88_s28 }
   0xe   :  { %v58_v2 = vadd.f32 %v57_v1, %v56_v0  ;;  %v78_v14 = vld [vmem:[#allocation7] sm:$0xff]  ;;  %s86_s2 = sshll.u32 %s213_s0, 4  ;;  %s87_s2 = int_to_ptr.vmem [resolvable:$true] %s86_s2 }
  0x10   :  { %v99_v3 = vmul.f32 -1.442695, %v58_v2 }
  0x12   :  { %104 = vpow2.f32 %v99_v3 }
  0x18   :  { %v105_v4 = vpop.eup %104 }
  0x19   :  { %v62_v5 = vadd.f32 1.0, %v105_v4 }
  0x1b   :  { %106 = vrcp.f32 %v62_v5  ;;  %v74_v8 = vand.u32 2147483648, %v62_v5  ;;  %vm68_vm0 = vweird.f32 %v62_v5  ;;  %v72_v10 = vand.u32 2147483647, %v62_v5 }
  0x1d   :  { %v75_v12 = vor.u32 1.1754944e-38, %v74_v8  ;;  %vm73_vm3 = vcmp.eq.f32.partialorder %v72_v10, 8.507059e+37 }
  0x21   :  { %v107_v6 = vpop.eup %106 }
  0x22   :  { %v64_v7 = vmul.f32 %v107_v6, %v62_v5  ;;  %vm69_vm1 = vweird.f32 %v107_v6 }
  0x23   :  { %vm70_vm2 = vmor %vm68_vm0, %vm69_vm1 }
  0x24   :  { %v65_v9 = vsub.f32 1.0, %v64_v7 }
  0x26   :  { %v66_v11 = vmul.f32 %v107_v6, %v65_v9 }
  0x28   :  { %v67_v13 = vadd.f32 %v107_v6, %v66_v11 }
  0x2a   :  { %v71_v15 = vsel %vm70_vm2, %v107_v6, %v67_v13 }
  0x2b   :  { %v76_v16 = vsel %vm73_vm3, %v75_v12, %v71_v15 }
  0x2c   :  { %v79_v17 = vmul.f32 %v78_v14, %v76_v16 }
  0x2e   :  { %80 = vst [vmem:[#allocation8] sm:$0xff] %v79_v17 }
  0x2f   :  { %91 = dma.vmem_to_hbm [thread:$0]  %s87_s2, 128, %s89_s28, [#allocation4]  }
  0x30   :  { %208 = dma.done.wait [#allocation4], 128  }
  0x31   :  { %209 = vsyncadd [#allocation4], 4294967168 }
  0x32   :  { %96 = vsyncpa [#allocation3], 1 }
  0x33   :  { %97 = vsyncpa [#allocation6], 1 }
  0x34   :  { %98 = vsyncpa [#allocation4], 1 }

</bundles_post_ra>
